<compile_context>
chip_gen: v6e
topology: v6e:2x2x1
jax: 0.10.0
libtpu: 0.0.40
codegen_flags: <defaults>
</compile_context>

<pallas_src>
import functools

import jax
import jax.numpy as jnp
from jax.experimental import pallas as pl
from jax.experimental.pallas import tpu as pltpu


# ----------------------------------------------------------------------------
# Pallas kernel: fused pointwise(1x1) + depthwise(KxK, stride=1, zero pad) conv
# ----------------------------------------------------------------------------
def _bsconvu_kernel(x_ref, w_ref, o_ref, *, batch, cin, ksize, pad, width):
    # x_ref : (B, Cin,  H*W)          VMEM, lane-dense (H*W on the lane axis)
    # w_ref : (Cout, Cin + K*K + 1)   VMEM, packed [pointwise | depthwise taps | bias]
    # o_ref : (B, Cout, H*W)          VMEM, lane-dense
    _, _, hw = x_ref.shape
    cout = o_ref.shape[1]
    K = ksize
    W = width

    w = w_ref[...].astype(jnp.float32)                      # (Cout, NCOL) — one vreg tile
    bias_col = w[:, cin + K * K:cin + K * K + 1]             # (Cout, 1)
    bias_full = jnp.broadcast_to(bias_col, (cout, hw))        # hoisted: accumulator init

    # Lane-position iotas at (1, HW); compares/selects broadcast against (Cout, HW).
    pos = jax.lax.broadcasted_iota(jnp.int32, (1, hw), 1)     # flat spatial position
    col = pos % W                                             # w-coordinate per lane

    # Masks hoisted out of the batch/tap loops (JAX does not CSE broadcasts).
    left_mask = {dw: col < dw for dw in range(1, K - pad)}           # horizontal wrap, dw > 0
    right_mask = {dw: col >= W + dw for dw in range(-pad, 0)}        # horizontal wrap, dw < 0
    tail_mask = {}                                                   # vertical wrap after roll
    for kh in range(K):
        for kw in range(K):
            delta = (kh - pad) * W + (kw - pad)
            if delta > 0:
                tail_mask[delta] = pos >= hw - delta
            elif delta < 0:
                tail_mask[delta] = pos < -delta

    for b in range(batch):                                    # B=2: unrolled, single invocation
        x = x_ref[b].astype(jnp.float32)                      # (Cin, H*W)

        # ---- pointwise 1x1 conv: Cin VPU broadcast-FMAs (channels too small for MXU) ----
        y = w[:, 0:1] * x[0:1, :]                             # (Cout,1)*(1,HW) -> (Cout,HW)
        for ci in range(1, cin):
            y = y + w[:, ci:ci + 1] * x[ci:ci + 1, :]

        # ---- depthwise KxK conv on the flat spatial axis.  Tap (kh,kw) is a flat circular
        # roll by (kh-pad)*W + (kw-pad); horizontal wrap is removed by pre-zeroing the source
        # columns that would wrap (shared across kh), vertical wrap by the post-roll mask. ----
        src_by_dw = {}
        for dw in range(-pad, K - pad):
            if dw > 0:
                src_by_dw[dw] = jnp.where(left_mask[dw], 0.0, y)
            elif dw < 0:
                src_by_dw[dw] = jnp.where(right_mask[dw], 0.0, y)
            else:
                src_by_dw[dw] = y

        acc = bias_full                                        # start from broadcast bias
        for kh in range(K):
            dh = kh - pad
            for kw in range(K):
                dw = kw - pad
                delta = dh * W + dw
                src = src_by_dw[dw]
                if delta == 0:
                    tap = src
                else:
                    tap = pltpu.roll(src, shift=(-delta) % hw, axis=1)   # tap[p] = src[p+delta]
                    tap = jnp.where(tail_mask[delta], 0.0, tap)
                acc = acc + tap * w[:, cin + kh * K + kw:cin + kh * K + kw + 1]

        o_ref[b] = acc.astype(o_ref.dtype)


# ----------------------------------------------------------------------------
# Wrapper: NCHW in / NCHW out (PyTorch convention) — reshapes only, no transposes of x
# ----------------------------------------------------------------------------
def bsconvu_forward(x_nchw, w_pw, w_dw, b_dw, *, padding=1):
    """x: (B,Cin,H,W); w_pw: (Cout,Cin); w_dw: (Cout,K,K); b_dw: (Cout,)."""
    B, Cin, H, W = x_nchw.shape
    Cout, K, _ = w_dw.shape
    HW = H * W
    # TODO(synk): stride != 1, dilation != 1 and non-'zeros' padding_mode options of the generic
    # BSConvU constructor are not implemented (module defaults K=3/s=1/p=1/'zeros' are).

    x_flat = x_nchw.reshape(B, Cin, HW)                               # free reshape
    w_packed = jnp.concatenate(
        [w_pw.astype(jnp.float32),
         w_dw.reshape(Cout, K * K).astype(jnp.float32),
         b_dw.reshape(Cout, 1).astype(jnp.float32)],
        axis=1)                                                       # (Cout, Cin + K*K + 1)

    kernel = functools.partial(
        _bsconvu_kernel, batch=B, cin=Cin, ksize=K, pad=padding, width=W)

    flops = 2 * B * HW * (Cin * Cout + Cout * K * K)
    bytes_accessed = 4 * (B * Cin * HW + B * Cout * HW + w_packed.size)
    cost = pl.CostEstimate(flops=flops, transcendentals=0, bytes_accessed=bytes_accessed)

    out_flat = pl.pallas_call(
        kernel,
        out_shape=jax.ShapeDtypeStruct((B, Cout, HW), x_nchw.dtype),
        in_specs=[
            pl.BlockSpec(memory_space=pltpu.MemorySpace.VMEM),        # whole x in VMEM (8 KB)
            pl.BlockSpec(memory_space=pltpu.MemorySpace.VMEM),        # packed params (448 B)
        ],
        out_specs=pl.BlockSpec(memory_space=pltpu.MemorySpace.VMEM),  # whole out (16 KB)
        cost_estimate=cost,
    )(x_flat, w_packed)

    return out_flat.reshape(B, Cout, H, W)


# ----------------------------------------------------------------------------
# Pure-JAX reference (lax convs) for correctness check
# ----------------------------------------------------------------------------
def bsconvu_reference(x_nchw, w_pw, w_dw, b_dw):
    Cout = w_pw.shape[0]
    y = jax.lax.conv_general_dilated(
        x_nchw, w_pw[:, :, None, None], (1, 1), "VALID",
        dimension_numbers=("NCHW", "OIHW", "NCHW"),
    )
    z = jax.lax.conv_general_dilated(
        y, w_dw[:, None, :, :], (1, 1), ((1, 1), (1, 1)),
        dimension_numbers=("NCHW", "OIHW", "NCHW"),
        feature_group_count=Cout,
    )
    return z + b_dw[None, :, None, None]


if __name__ == "__main__":
    # Small shapes consistent with the module: in_channels=4, out_channels=8.
    B, Cin, H, W = 2, 4, 16, 16
    Cout, K = 8, 3

    key = jax.random.PRNGKey(0)
    kx, kpw, kdw, kb = jax.random.split(key, 4)

    x = jax.random.normal(kx, (B, Cin, H, W), dtype=jnp.float32)

    # Deterministic parameter init (kaiming-uniform-ish bounds, like nn.Conv2d).
    pw_bound = 1.0 / jnp.sqrt(Cin * 1 * 1)
    w_pw = jax.random.uniform(kpw, (Cout, Cin), jnp.float32, -pw_bound, pw_bound)

    dw_bound = 1.0 / jnp.sqrt(1 * K * K)   # groups=Cout -> fan_in = K*K
    w_dw = jax.random.uniform(kdw, (Cout, K, K), jnp.float32, -dw_bound, dw_bound)
    b_dw = jax.random.uniform(kb, (Cout,), jnp.float32, -dw_bound, dw_bound)

    fwd = jax.jit(bsconvu_forward)
    out = jax.block_until_ready(fwd(x, w_pw, w_dw, b_dw))

    ref = jax.block_until_ready(bsconvu_reference(x, w_pw, w_dw, b_dw))
    assert out.shape == (B, Cout, H, W), out.shape
    assert jnp.allclose(out, ref, atol=1e-5, rtol=1e-5), "mismatch vs reference"

    print("KERNEL_OK")
</pallas_src>

<mosaic_0001>
module attributes {stable_mosaic.version = 11 : i64} {
  func.func @_bsconvu_kernel(%arg0: memref<2x4x256xf32, #tpu.memory_space<vmem>>, %arg1: memref<8x14xf32, #tpu.memory_space<vmem>>, %arg2: memref<2x8x256xf32, #tpu.memory_space<vmem>>) attributes {dimension_semantics = [], scalar_prefetch = 0 : i64, scratch_operands = 0 : i64, tpu.core_type = #tpu.core_type<tc>} {
    %c0 = arith.constant 0 : index
    %c0_0 = arith.constant 0 : index
    %0 = vector.load %arg1[%c0, %c0_0] : memref<8x14xf32, #tpu.memory_space<vmem>>, vector<8x14xf32>
    %1 = vector.extract_strided_slice %0 {offsets = [0, 13], sizes = [8, 1], strides = [1, 1]} : vector<8x14xf32> to vector<8x1xf32>
    %2 = vector.shape_cast %1 : vector<8x1xf32> to vector<8x1xf32>
    %3 = vector.broadcast %2 : vector<8x1xf32> to vector<8x256xf32>
    %4 = tpu.iota {dimensions = array<i32: 1>} : vector<1x256xi32>
    %c16_i32 = arith.constant 16 : i32
    %c0_i32 = arith.constant 0 : i32
    %5 = arith.cmpi eq, %c16_i32, %c0_i32 : i32
    %c1_i32 = arith.constant 1 : i32
    %6 = arith.select %5, %c1_i32, %c16_i32 : i32
    %7 = vector.broadcast %6 : i32 to vector<1x256xi32>
    %8 = arith.remsi %4, %7 : vector<1x256xi32>
    %c0_i32_1 = arith.constant 0 : i32
    %9 = vector.broadcast %c0_i32_1 : i32 to vector<1x256xi32>
    %10 = arith.cmpi ne, %8, %9 : vector<1x256xi32>
    %c0_i32_2 = arith.constant 0 : i32
    %11 = vector.broadcast %c0_i32_2 : i32 to vector<1x256xi32>
    %12 = arith.cmpi slt, %8, %11 : vector<1x256xi32>
    %c0_i32_3 = arith.constant 0 : i32
    %13 = arith.cmpi slt, %6, %c0_i32_3 : i32
    %14 = vector.broadcast %13 : i1 to vector<1x256xi1>
    %15 = vector.broadcast %14 : vector<1x256xi1> to vector<1x256xi1>
    %16 = arith.xori %12, %15 : vector<1x256xi1>
    %17 = arith.andi %16, %10 : vector<1x256xi1>
    %18 = vector.broadcast %6 : i32 to vector<1x256xi32>
    %19 = arith.addi %8, %18 : vector<1x256xi32>
    %20 = arith.select %17, %19, %8 : vector<1x256xi1>, vector<1x256xi32>
    %c1_i32_4 = arith.constant 1 : i32
    %21 = vector.broadcast %c1_i32_4 : i32 to vector<1x256xi32>
    %22 = arith.cmpi slt, %20, %21 : vector<1x256xi32>
    %c15_i32 = arith.constant 15 : i32
    %23 = vector.broadcast %c15_i32 : i32 to vector<1x256xi32>
    %24 = arith.cmpi sge, %20, %23 : vector<1x256xi32>
    %c17_i32 = arith.constant 17 : i32
    %25 = vector.broadcast %c17_i32 : i32 to vector<1x256xi32>
    %26 = arith.cmpi slt, %4, %25 : vector<1x256xi32>
    %c16_i32_5 = arith.constant 16 : i32
    %27 = vector.broadcast %c16_i32_5 : i32 to vector<1x256xi32>
    %28 = arith.cmpi slt, %4, %27 : vector<1x256xi32>
    %c15_i32_6 = arith.constant 15 : i32
    %29 = vector.broadcast %c15_i32_6 : i32 to vector<1x256xi32>
    %30 = arith.cmpi slt, %4, %29 : vector<1x256xi32>
    %c1_i32_7 = arith.constant 1 : i32
    %31 = vector.broadcast %c1_i32_7 : i32 to vector<1x256xi32>
    %32 = arith.cmpi slt, %4, %31 : vector<1x256xi32>
    %c255_i32 = arith.constant 255 : i32
    %33 = vector.broadcast %c255_i32 : i32 to vector<1x256xi32>
    %34 = arith.cmpi sge, %4, %33 : vector<1x256xi32>
    %c241_i32 = arith.constant 241 : i32
    %35 = vector.broadcast %c241_i32 : i32 to vector<1x256xi32>
    %36 = arith.cmpi sge, %4, %35 : vector<1x256xi32>
    %c240_i32 = arith.constant 240 : i32
    %37 = vector.broadcast %c240_i32 : i32 to vector<1x256xi32>
    %38 = arith.cmpi sge, %4, %37 : vector<1x256xi32>
    %c239_i32 = arith.constant 239 : i32
    %39 = vector.broadcast %c239_i32 : i32 to vector<1x256xi32>
    %40 = arith.cmpi sge, %4, %39 : vector<1x256xi32>
    %c0_8 = arith.constant 0 : index
    %c0_9 = arith.constant 0 : index
    %c0_10 = arith.constant 0 : index
    %41 = vector.load %arg0[%c0_8, %c0_9, %c0_10] : memref<2x4x256xf32, #tpu.memory_space<vmem>>, vector<1x4x256xf32>
    %42 = vector.shape_cast %41 : vector<1x4x256xf32> to vector<4x256xf32>
    %43 = vector.extract_strided_slice %0 {offsets = [0, 0], sizes = [8, 1], strides = [1, 1]} : vector<8x14xf32> to vector<8x1xf32>
    %44 = vector.extract_strided_slice %42 {offsets = [0, 0], sizes = [1, 256], strides = [1, 1]} : vector<4x256xf32> to vector<1x256xf32>
    %45 = vector.broadcast %43 : vector<8x1xf32> to vector<8x256xf32>
    %46 = vector.broadcast %44 : vector<1x256xf32> to vector<8x256xf32>
    %47 = arith.mulf %45, %46 : vector<8x256xf32>
    %48 = vector.extract_strided_slice %0 {offsets = [0, 1], sizes = [8, 1], strides = [1, 1]} : vector<8x14xf32> to vector<8x1xf32>
    %49 = vector.extract_strided_slice %42 {offsets = [1, 0], sizes = [1, 256], strides = [1, 1]} : vector<4x256xf32> to vector<1x256xf32>
    %50 = vector.broadcast %48 : vector<8x1xf32> to vector<8x256xf32>
    %51 = vector.broadcast %49 : vector<1x256xf32> to vector<8x256xf32>
    %52 = arith.mulf %50, %51 : vector<8x256xf32>
    %53 = arith.addf %47, %52 : vector<8x256xf32>
    %54 = vector.extract_strided_slice %0 {offsets = [0, 2], sizes = [8, 1], strides = [1, 1]} : vector<8x14xf32> to vector<8x1xf32>
    %55 = vector.extract_strided_slice %42 {offsets = [2, 0], sizes = [1, 256], strides = [1, 1]} : vector<4x256xf32> to vector<1x256xf32>
    %56 = vector.broadcast %54 : vector<8x1xf32> to vector<8x256xf32>
    %57 = vector.broadcast %55 : vector<1x256xf32> to vector<8x256xf32>
    %58 = arith.mulf %56, %57 : vector<8x256xf32>
    %59 = arith.addf %53, %58 : vector<8x256xf32>
    %60 = vector.extract_strided_slice %0 {offsets = [0, 3], sizes = [8, 1], strides = [1, 1]} : vector<8x14xf32> to vector<8x1xf32>
    %61 = vector.extract_strided_slice %42 {offsets = [3, 0], sizes = [1, 256], strides = [1, 1]} : vector<4x256xf32> to vector<1x256xf32>
    %62 = vector.broadcast %60 : vector<8x1xf32> to vector<8x256xf32>
    %63 = vector.broadcast %61 : vector<1x256xf32> to vector<8x256xf32>
    %64 = arith.mulf %62, %63 : vector<8x256xf32>
    %65 = arith.addf %59, %64 : vector<8x256xf32>
    %cst = arith.constant 0.000000e+00 : f32
    %66 = vector.shape_cast %24 : vector<1x256xi1> to vector<1x256xi1>
    %67 = vector.broadcast %66 : vector<1x256xi1> to vector<8x256xi1>
    %68 = vector.broadcast %cst : f32 to vector<8x256xf32>
    %69 = arith.select %67, %68, %65 : vector<8x256xi1>, vector<8x256xf32>
    %cst_11 = arith.constant 0.000000e+00 : f32
    %70 = vector.shape_cast %22 : vector<1x256xi1> to vector<1x256xi1>
    %71 = vector.broadcast %70 : vector<1x256xi1> to vector<8x256xi1>
    %72 = vector.broadcast %cst_11 : f32 to vector<8x256xf32>
    %73 = arith.select %71, %72, %65 : vector<8x256xi1>, vector<8x256xf32>
    %c17_i32_12 = arith.constant 17 : i32
    %74 = tpu.dynamic_rotate %69 by %c17_i32_12 dim 1 : vector<8x256xf32>, i32 -> vector<8x256xf32>
    %cst_13 = arith.constant 0.000000e+00 : f32
    %75 = vector.shape_cast %26 : vector<1x256xi1> to vector<1x256xi1>
    %76 = vector.broadcast %75 : vector<1x256xi1> to vector<8x256xi1>
    %77 = vector.broadcast %cst_13 : f32 to vector<8x256xf32>
    %78 = arith.select %76, %77, %74 : vector<8x256xi1>, vector<8x256xf32>
    %79 = vector.extract_strided_slice %0 {offsets = [0, 4], sizes = [8, 1], strides = [1, 1]} : vector<8x14xf32> to vector<8x1xf32>
    %80 = vector.broadcast %79 : vector<8x1xf32> to vector<8x256xf32>
    %81 = arith.mulf %78, %80 : vector<8x256xf32>
    %82 = arith.addf %3, %81 : vector<8x256xf32>
    %c16_i32_14 = arith.constant 16 : i32
    %83 = tpu.dynamic_rotate %65 by %c16_i32_14 dim 1 : vector<8x256xf32>, i32 -> vector<8x256xf32>
    %cst_15 = arith.constant 0.000000e+00 : f32
    %84 = vector.shape_cast %28 : vector<1x256xi1> to vector<1x256xi1>
    %85 = vector.broadcast %84 : vector<1x256xi1> to vector<8x256xi1>
    %86 = vector.broadcast %cst_15 : f32 to vector<8x256xf32>
    %87 = arith.select %85, %86, %83 : vector<8x256xi1>, vector<8x256xf32>
    %88 = vector.extract_strided_slice %0 {offsets = [0, 5], sizes = [8, 1], strides = [1, 1]} : vector<8x14xf32> to vector<8x1xf32>
    %89 = vector.broadcast %88 : vector<8x1xf32> to vector<8x256xf32>
    %90 = arith.mulf %87, %89 : vector<8x256xf32>
    %91 = arith.addf %82, %90 : vector<8x256xf32>
    %c15_i32_16 = arith.constant 15 : i32
    %92 = tpu.dynamic_rotate %73 by %c15_i32_16 dim 1 : vector<8x256xf32>, i32 -> vector<8x256xf32>
    %cst_17 = arith.constant 0.000000e+00 : f32
    %93 = vector.shape_cast %30 : vector<1x256xi1> to vector<1x256xi1>
    %94 = vector.broadcast %93 : vector<1x256xi1> to vector<8x256xi1>
    %95 = vector.broadcast %cst_17 : f32 to vector<8x256xf32>
    %96 = arith.select %94, %95, %92 : vector<8x256xi1>, vector<8x256xf32>
    %97 = vector.extract_strided_slice %0 {offsets = [0, 6], sizes = [8, 1], strides = [1, 1]} : vector<8x14xf32> to vector<8x1xf32>
    %98 = vector.broadcast %97 : vector<8x1xf32> to vector<8x256xf32>
    %99 = arith.mulf %96, %98 : vector<8x256xf32>
    %100 = arith.addf %91, %99 : vector<8x256xf32>
    %c1_i32_18 = arith.constant 1 : i32
    %101 = tpu.dynamic_rotate %69 by %c1_i32_18 dim 1 : vector<8x256xf32>, i32 -> vector<8x256xf32>
    %cst_19 = arith.constant 0.000000e+00 : f32
    %102 = vector.shape_cast %32 : vector<1x256xi1> to vector<1x256xi1>
    %103 = vector.broadcast %102 : vector<1x256xi1> to vector<8x256xi1>
    %104 = vector.broadcast %cst_19 : f32 to vector<8x256xf32>
    %105 = arith.select %103, %104, %101 : vector<8x256xi1>, vector<8x256xf32>
    %106 = vector.extract_strided_slice %0 {offsets = [0, 7], sizes = [8, 1], strides = [1, 1]} : vector<8x14xf32> to vector<8x1xf32>
    %107 = vector.broadcast %106 : vector<8x1xf32> to vector<8x256xf32>
    %108 = arith.mulf %105, %107 : vector<8x256xf32>
    %109 = arith.addf %100, %108 : vector<8x256xf32>
    %110 = vector.extract_strided_slice %0 {offsets = [0, 8], sizes = [8, 1], strides = [1, 1]} : vector<8x14xf32> to vector<8x1xf32>
    %111 = vector.broadcast %110 : vector<8x1xf32> to vector<8x256xf32>
    %112 = arith.mulf %65, %111 : vector<8x256xf32>
    %113 = arith.addf %109, %112 : vector<8x256xf32>
    %c255_i32_20 = arith.constant 255 : i32
    %114 = tpu.dynamic_rotate %73 by %c255_i32_20 dim 1 : vector<8x256xf32>, i32 -> vector<8x256xf32>
    %cst_21 = arith.constant 0.000000e+00 : f32
    %115 = vector.shape_cast %34 : vector<1x256xi1> to vector<1x256xi1>
    %116 = vector.broadcast %115 : vector<1x256xi1> to vector<8x256xi1>
    %117 = vector.broadcast %cst_21 : f32 to vector<8x256xf32>
    %118 = arith.select %116, %117, %114 : vector<8x256xi1>, vector<8x256xf32>
    %119 = vector.extract_strided_slice %0 {offsets = [0, 9], sizes = [8, 1], strides = [1, 1]} : vector<8x14xf32> to vector<8x1xf32>
    %120 = vector.broadcast %119 : vector<8x1xf32> to vector<8x256xf32>
    %121 = arith.mulf %118, %120 : vector<8x256xf32>
    %122 = arith.addf %113, %121 : vector<8x256xf32>
    %c241_i32_22 = arith.constant 241 : i32
    %123 = tpu.dynamic_rotate %69 by %c241_i32_22 dim 1 : vector<8x256xf32>, i32 -> vector<8x256xf32>
    %cst_23 = arith.constant 0.000000e+00 : f32
    %124 = vector.shape_cast %36 : vector<1x256xi1> to vector<1x256xi1>
    %125 = vector.broadcast %124 : vector<1x256xi1> to vector<8x256xi1>
    %126 = vector.broadcast %cst_23 : f32 to vector<8x256xf32>
    %127 = arith.select %125, %126, %123 : vector<8x256xi1>, vector<8x256xf32>
    %128 = vector.extract_strided_slice %0 {offsets = [0, 10], sizes = [8, 1], strides = [1, 1]} : vector<8x14xf32> to vector<8x1xf32>
    %129 = vector.broadcast %128 : vector<8x1xf32> to vector<8x256xf32>
    %130 = arith.mulf %127, %129 : vector<8x256xf32>
    %131 = arith.addf %122, %130 : vector<8x256xf32>
    %c240_i32_24 = arith.constant 240 : i32
    %132 = tpu.dynamic_rotate %65 by %c240_i32_24 dim 1 : vector<8x256xf32>, i32 -> vector<8x256xf32>
    %cst_25 = arith.constant 0.000000e+00 : f32
    %133 = vector.shape_cast %38 : vector<1x256xi1> to vector<1x256xi1>
    %134 = vector.broadcast %133 : vector<1x256xi1> to vector<8x256xi1>
    %135 = vector.broadcast %cst_25 : f32 to vector<8x256xf32>
    %136 = arith.select %134, %135, %132 : vector<8x256xi1>, vector<8x256xf32>
    %137 = vector.extract_strided_slice %0 {offsets = [0, 11], sizes = [8, 1], strides = [1, 1]} : vector<8x14xf32> to vector<8x1xf32>
    %138 = vector.broadcast %137 : vector<8x1xf32> to vector<8x256xf32>
    %139 = arith.mulf %136, %138 : vector<8x256xf32>
    %140 = arith.addf %131, %139 : vector<8x256xf32>
    %c239_i32_26 = arith.constant 239 : i32
    %141 = tpu.dynamic_rotate %73 by %c239_i32_26 dim 1 : vector<8x256xf32>, i32 -> vector<8x256xf32>
    %cst_27 = arith.constant 0.000000e+00 : f32
    %142 = vector.shape_cast %40 : vector<1x256xi1> to vector<1x256xi1>
    %143 = vector.broadcast %142 : vector<1x256xi1> to vector<8x256xi1>
    %144 = vector.broadcast %cst_27 : f32 to vector<8x256xf32>
    %145 = arith.select %143, %144, %141 : vector<8x256xi1>, vector<8x256xf32>
    %146 = vector.extract_strided_slice %0 {offsets = [0, 12], sizes = [8, 1], strides = [1, 1]} : vector<8x14xf32> to vector<8x1xf32>
    %147 = vector.broadcast %146 : vector<8x1xf32> to vector<8x256xf32>
    %148 = arith.mulf %145, %147 : vector<8x256xf32>
    %149 = arith.addf %140, %148 : vector<8x256xf32>
    %c0_28 = arith.constant 0 : index
    %c0_29 = arith.constant 0 : index
    %c0_30 = arith.constant 0 : index
    %150 = vector.load %arg2[%c0_28, %c0_29, %c0_30] : memref<2x8x256xf32, #tpu.memory_space<vmem>>, vector<1x8x256xf32>
    %151 = vector.shape_cast %150 : vector<1x8x256xf32> to vector<8x256xf32>
    %152 = vector.shape_cast %149 : vector<8x256xf32> to vector<1x8x256xf32>
    tpu.vector_store %arg2[%c0_28, %c0_29, %c0_30], %152 {strides = array<i32>} : memref<2x8x256xf32, #tpu.memory_space<vmem>>, vector<1x8x256xf32>,
    %c1 = arith.constant 1 : index
    %c0_31 = arith.constant 0 : index
    %c0_32 = arith.constant 0 : index
    %153 = vector.load %arg0[%c1, %c0_31, %c0_32] : memref<2x4x256xf32, #tpu.memory_space<vmem>>, vector<1x4x256xf32>
    %154 = vector.shape_cast %153 : vector<1x4x256xf32> to vector<4x256xf32>
    %155 = vector.extract_strided_slice %0 {offsets = [0, 0], sizes = [8, 1], strides = [1, 1]} : vector<8x14xf32> to vector<8x1xf32>
    %156 = vector.extract_strided_slice %154 {offsets = [0, 0], sizes = [1, 256], strides = [1, 1]} : vector<4x256xf32> to vector<1x256xf32>
    %157 = vector.broadcast %155 : vector<8x1xf32> to vector<8x256xf32>
    %158 = vector.broadcast %156 : vector<1x256xf32> to vector<8x256xf32>
    %159 = arith.mulf %157, %158 : vector<8x256xf32>
    %160 = vector.extract_strided_slice %0 {offsets = [0, 1], sizes = [8, 1], strides = [1, 1]} : vector<8x14xf32> to vector<8x1xf32>
    %161 = vector.extract_strided_slice %154 {offsets = [1, 0], sizes = [1, 256], strides = [1, 1]} : vector<4x256xf32> to vector<1x256xf32>
    %162 = vector.broadcast %160 : vector<8x1xf32> to vector<8x256xf32>
    %163 = vector.broadcast %161 : vector<1x256xf32> to vector<8x256xf32>
    %164 = arith.mulf %162, %163 : vector<8x256xf32>
    %165 = arith.addf %159, %164 : vector<8x256xf32>
    %166 = vector.extract_strided_slice %0 {offsets = [0, 2], sizes = [8, 1], strides = [1, 1]} : vector<8x14xf32> to vector<8x1xf32>
    %167 = vector.extract_strided_slice %154 {offsets = [2, 0], sizes = [1, 256], strides = [1, 1]} : vector<4x256xf32> to vector<1x256xf32>
    %168 = vector.broadcast %166 : vector<8x1xf32> to vector<8x256xf32>
    %169 = vector.broadcast %167 : vector<1x256xf32> to vector<8x256xf32>
    %170 = arith.mulf %168, %169 : vector<8x256xf32>
    %171 = arith.addf %165, %170 : vector<8x256xf32>
    %172 = vector.extract_strided_slice %0 {offsets = [0, 3], sizes = [8, 1], strides = [1, 1]} : vector<8x14xf32> to vector<8x1xf32>
    %173 = vector.extract_strided_slice %154 {offsets = [3, 0], sizes = [1, 256], strides = [1, 1]} : vector<4x256xf32> to vector<1x256xf32>
    %174 = vector.broadcast %172 : vector<8x1xf32> to vector<8x256xf32>
    %175 = vector.broadcast %173 : vector<1x256xf32> to vector<8x256xf32>
    %176 = arith.mulf %174, %175 : vector<8x256xf32>
    %177 = arith.addf %171, %176 : vector<8x256xf32>
    %cst_33 = arith.constant 0.000000e+00 : f32
    %178 = vector.shape_cast %24 : vector<1x256xi1> to vector<1x256xi1>
    %179 = vector.broadcast %178 : vector<1x256xi1> to vector<8x256xi1>
    %180 = vector.broadcast %cst_33 : f32 to vector<8x256xf32>
    %181 = arith.select %179, %180, %177 : vector<8x256xi1>, vector<8x256xf32>
    %cst_34 = arith.constant 0.000000e+00 : f32
    %182 = vector.shape_cast %22 : vector<1x256xi1> to vector<1x256xi1>
    %183 = vector.broadcast %182 : vector<1x256xi1> to vector<8x256xi1>
    %184 = vector.broadcast %cst_34 : f32 to vector<8x256xf32>
    %185 = arith.select %183, %184, %177 : vector<8x256xi1>, vector<8x256xf32>
    %c17_i32_35 = arith.constant 17 : i32
    %186 = tpu.dynamic_rotate %181 by %c17_i32_35 dim 1 : vector<8x256xf32>, i32 -> vector<8x256xf32>
    %cst_36 = arith.constant 0.000000e+00 : f32
    %187 = vector.shape_cast %26 : vector<1x256xi1> to vector<1x256xi1>
    %188 = vector.broadcast %187 : vector<1x256xi1> to vector<8x256xi1>
    %189 = vector.broadcast %cst_36 : f32 to vector<8x256xf32>
    %190 = arith.select %188, %189, %186 : vector<8x256xi1>, vector<8x256xf32>
    %191 = vector.extract_strided_slice %0 {offsets = [0, 4], sizes = [8, 1], strides = [1, 1]} : vector<8x14xf32> to vector<8x1xf32>
    %192 = vector.broadcast %191 : vector<8x1xf32> to vector<8x256xf32>
    %193 = arith.mulf %190, %192 : vector<8x256xf32>
    %194 = arith.addf %3, %193 : vector<8x256xf32>
    %c16_i32_37 = arith.constant 16 : i32
    %195 = tpu.dynamic_rotate %177 by %c16_i32_37 dim 1 : vector<8x256xf32>, i32 -> vector<8x256xf32>
    %cst_38 = arith.constant 0.000000e+00 : f32
    %196 = vector.shape_cast %28 : vector<1x256xi1> to vector<1x256xi1>
    %197 = vector.broadcast %196 : vector<1x256xi1> to vector<8x256xi1>
    %198 = vector.broadcast %cst_38 : f32 to vector<8x256xf32>
    %199 = arith.select %197, %198, %195 : vector<8x256xi1>, vector<8x256xf32>
    %200 = vector.extract_strided_slice %0 {offsets = [0, 5], sizes = [8, 1], strides = [1, 1]} : vector<8x14xf32> to vector<8x1xf32>
    %201 = vector.broadcast %200 : vector<8x1xf32> to vector<8x256xf32>
    %202 = arith.mulf %199, %201 : vector<8x256xf32>
    %203 = arith.addf %194, %202 : vector<8x256xf32>
    %c15_i32_39 = arith.constant 15 : i32
    %204 = tpu.dynamic_rotate %185 by %c15_i32_39 dim 1 : vector<8x256xf32>, i32 -> vector<8x256xf32>
    %cst_40 = arith.constant 0.000000e+00 : f32
    %205 = vector.shape_cast %30 : vector<1x256xi1> to vector<1x256xi1>
    %206 = vector.broadcast %205 : vector<1x256xi1> to vector<8x256xi1>
    %207 = vector.broadcast %cst_40 : f32 to vector<8x256xf32>
    %208 = arith.select %206, %207, %204 : vector<8x256xi1>, vector<8x256xf32>
    %209 = vector.extract_strided_slice %0 {offsets = [0, 6], sizes = [8, 1], strides = [1, 1]} : vector<8x14xf32> to vector<8x1xf32>
    %210 = vector.broadcast %209 : vector<8x1xf32> to vector<8x256xf32>
    %211 = arith.mulf %208, %210 : vector<8x256xf32>
    %212 = arith.addf %203, %211 : vector<8x256xf32>
    %c1_i32_41 = arith.constant 1 : i32
    %213 = tpu.dynamic_rotate %181 by %c1_i32_41 dim 1 : vector<8x256xf32>, i32 -> vector<8x256xf32>
    %cst_42 = arith.constant 0.000000e+00 : f32
    %214 = vector.shape_cast %32 : vector<1x256xi1> to vector<1x256xi1>
    %215 = vector.broadcast %214 : vector<1x256xi1> to vector<8x256xi1>
    %216 = vector.broadcast %cst_42 : f32 to vector<8x256xf32>
    %217 = arith.select %215, %216, %213 : vector<8x256xi1>, vector<8x256xf32>
    %218 = vector.extract_strided_slice %0 {offsets = [0, 7], sizes = [8, 1], strides = [1, 1]} : vector<8x14xf32> to vector<8x1xf32>
    %219 = vector.broadcast %218 : vector<8x1xf32> to vector<8x256xf32>
    %220 = arith.mulf %217, %219 : vector<8x256xf32>
    %221 = arith.addf %212, %220 : vector<8x256xf32>
    %222 = vector.extract_strided_slice %0 {offsets = [0, 8], sizes = [8, 1], strides = [1, 1]} : vector<8x14xf32> to vector<8x1xf32>
    %223 = vector.broadcast %222 : vector<8x1xf32> to vector<8x256xf32>
    %224 = arith.mulf %177, %223 : vector<8x256xf32>
    %225 = arith.addf %221, %224 : vector<8x256xf32>
    %c255_i32_43 = arith.constant 255 : i32
    %226 = tpu.dynamic_rotate %185 by %c255_i32_43 dim 1 : vector<8x256xf32>, i32 -> vector<8x256xf32>
    %cst_44 = arith.constant 0.000000e+00 : f32
    %227 = vector.shape_cast %34 : vector<1x256xi1> to vector<1x256xi1>
    %228 = vector.broadcast %227 : vector<1x256xi1> to vector<8x256xi1>
    %229 = vector.broadcast %cst_44 : f32 to vector<8x256xf32>
    %230 = arith.select %228, %229, %226 : vector<8x256xi1>, vector<8x256xf32>
    %231 = vector.extract_strided_slice %0 {offsets = [0, 9], sizes = [8, 1], strides = [1, 1]} : vector<8x14xf32> to vector<8x1xf32>
    %232 = vector.broadcast %231 : vector<8x1xf32> to vector<8x256xf32>
    %233 = arith.mulf %230, %232 : vector<8x256xf32>
    %234 = arith.addf %225, %233 : vector<8x256xf32>
    %c241_i32_45 = arith.constant 241 : i32
    %235 = tpu.dynamic_rotate %181 by %c241_i32_45 dim 1 : vector<8x256xf32>, i32 -> vector<8x256xf32>
    %cst_46 = arith.constant 0.000000e+00 : f32
    %236 = vector.shape_cast %36 : vector<1x256xi1> to vector<1x256xi1>
    %237 = vector.broadcast %236 : vector<1x256xi1> to vector<8x256xi1>
    %238 = vector.broadcast %cst_46 : f32 to vector<8x256xf32>
    %239 = arith.select %237, %238, %235 : vector<8x256xi1>, vector<8x256xf32>
    %240 = vector.extract_strided_slice %0 {offsets = [0, 10], sizes = [8, 1], strides = [1, 1]} : vector<8x14xf32> to vector<8x1xf32>
    %241 = vector.broadcast %240 : vector<8x1xf32> to vector<8x256xf32>
    %242 = arith.mulf %239, %241 : vector<8x256xf32>
    %243 = arith.addf %234, %242 : vector<8x256xf32>
    %c240_i32_47 = arith.constant 240 : i32
    %244 = tpu.dynamic_rotate %177 by %c240_i32_47 dim 1 : vector<8x256xf32>, i32 -> vector<8x256xf32>
    %cst_48 = arith.constant 0.000000e+00 : f32
    %245 = vector.shape_cast %38 : vector<1x256xi1> to vector<1x256xi1>
    %246 = vector.broadcast %245 : vector<1x256xi1> to vector<8x256xi1>
    %247 = vector.broadcast %cst_48 : f32 to vector<8x256xf32>
    %248 = arith.select %246, %247, %244 : vector<8x256xi1>, vector<8x256xf32>
    %249 = vector.extract_strided_slice %0 {offsets = [0, 11], sizes = [8, 1], strides = [1, 1]} : vector<8x14xf32> to vector<8x1xf32>
    %250 = vector.broadcast %249 : vector<8x1xf32> to vector<8x256xf32>
    %251 = arith.mulf %248, %250 : vector<8x256xf32>
    %252 = arith.addf %243, %251 : vector<8x256xf32>
    %c239_i32_49 = arith.constant 239 : i32
    %253 = tpu.dynamic_rotate %185 by %c239_i32_49 dim 1 : vector<8x256xf32>, i32 -> vector<8x256xf32>
    %cst_50 = arith.constant 0.000000e+00 : f32
    %254 = vector.shape_cast %40 : vector<1x256xi1> to vector<1x256xi1>
    %255 = vector.broadcast %254 : vector<1x256xi1> to vector<8x256xi1>
    %256 = vector.broadcast %cst_50 : f32 to vector<8x256xf32>
    %257 = arith.select %255, %256, %253 : vector<8x256xi1>, vector<8x256xf32>
    %258 = vector.extract_strided_slice %0 {offsets = [0, 12], sizes = [8, 1], strides = [1, 1]} : vector<8x14xf32> to vector<8x1xf32>
    %259 = vector.broadcast %258 : vector<8x1xf32> to vector<8x256xf32>
    %260 = arith.mulf %257, %259 : vector<8x256xf32>
    %261 = arith.addf %252, %260 : vector<8x256xf32>
    %c1_51 = arith.constant 1 : index
    %c0_52 = arith.constant 0 : index
    %c0_53 = arith.constant 0 : index
    %262 = vector.load %arg2[%c1_51, %c0_52, %c0_53] : memref<2x8x256xf32, #tpu.memory_space<vmem>>, vector<1x8x256xf32>
    %263 = vector.shape_cast %262 : vector<1x8x256xf32> to vector<8x256xf32>
    %264 = vector.shape_cast %261 : vector<8x256xf32> to vector<1x8x256xf32>
    tpu.vector_store %arg2[%c1_51, %c0_52, %c0_53], %264 {strides = array<i32>} : memref<2x8x256xf32, #tpu.memory_space<vmem>>, vector<1x8x256xf32>,
    return
  }
}

</mosaic_0001>

<bundles_post_ra>
// kernel: bsconvu_forward.1
= control target key start
LH: loop header
LB: loop body
LE: loop exit
PB: predicated region body
PF: predicated region fallthrough
CT: control target
= control target key end

     0   :  { %v593_v0 = vmov 0   ;;  %v594_v2 = vmov 2   ;;  %v595_v3 = vmov 1   ;;  %v596_v4 = vmov 3   ;;  %s608_s14 = smov 16   ;;  %s609_s15 = smov 17   ;;  %s928_s1 = inlined_call_operand.vmem [shape: f32[8,14], index: 1, kind: input, shape index: {}]   ;;  %s929_s0 = inlined_call_operand.vmem [shape: f32[2,4,256], index: 0, kind: input, shape index: {}]   ;;  %s930_s2 = inlined_call_operand.vmem [shape: f32[2,8,256], index: 2, kind: output, shape index: {}]  }
   0x1   :  { %579 = vset.pattern.permute.xlu0 %v593_v0  ;;  %v11_v1 = vld [vmem:[%s928_s1] sm:$0xff]  ;;  %581 = vset.pattern.permute.xlu1 %v594_v2  ;;  %v597_v5 = vmov 4   ;;  %v598_v6 = vmov 13   ;;  %v599_v7 = vmov 5   ;;  %v600_v8 = vmov 10   ;;  %v554_v22 = vld [vmem:[%s929_s0 + $0x8] sm:$0xff] }
   0x2   :  { %66 = vperm.xlu0 %579, %v11_v1   ;;  %117 = vperm.xlu1 %581, %v11_v1   ;;  %v601_v9 = vmov 6   ;;  %v602_v10 = vmov 11   ;;  %v603_v11 = vmov 7   ;;  %v604_v12 = vmov 8   ;;  %v64_v19 = vld [vmem:[%s929_s0] sm:$0xff]  ;;  %s607_s0 = smov 112  }
   0x3   :  { %v605_v13 = vmov 9   ;;  %v606_v14 = vmov 12   ;;  %v17_v15 = vlaneseq  ;;  %s610_s16 = smov 1   ;;  %s611_s17 = smov 127  }
   0x4   :  { %s612_s18 = smov 113   ;;  %s613_s19 = smov 15  }
   0x5   :  { %v633_v16 = vshrl.u32 %v17_v15, 7  ;;  %v667_v51 = vand.u32 127, %v17_v15  ;;  %s614_s20 = smov 111  }
   0x6   :  { %580 = vset.pattern.permute.xlu0 %v595_v3  ;;  %582 = vset.pattern.permute.xlu1 %v596_v4 }
   0x7   :  { %91 = vperm.xlu0 %580, %v11_v1   ;;  %143 = vperm.xlu1 %582, %v11_v1   ;;  %v636_v17 = vsub.s32 0, %v633_v16  ;;  %v76_v18 = vsub.s32 4, %v633_v16  ;;  %v96_v20 = vsub.s32 1, %v633_v16  ;;  %v100_v21 = vsub.s32 5, %v633_v16 }
   0x8   :  { %v648_v23 = vsub.s32 2, %v633_v16  ;;  %v651_v24 = vsub.s32 3, %v633_v16  ;;  %v126_v27 = vsub.s32 6, %v633_v16  ;;  %v152_v34 = vsub.s32 7, %v633_v16 }
   0x9   :  { %v73_v25 = vrot.slane %v64_v19, %v636_v17  ;;  %v77_v26 = vrot.slane %v64_v19, %v76_v18  ;;  %v360_v28 = vrot.slane %v554_v22, %v636_v17  ;;  %v97_v29 = vrot.slane %v64_v19, %v96_v20 }
   0xa   :  { %v101_v30 = vrot.slane %v64_v19, %v100_v21  ;;  %v380_v31 = vrot.slane %v554_v22, %v96_v20  ;;  %v123_v32 = vrot.slane %v64_v19, %v648_v23  ;;  %v402_v33 = vrot.slane %v554_v22, %v648_v23 }
   0xb   :  { %584 = vset.pattern.permute.xlu0 %v597_v5  ;;  %583 = vset.pattern.permute.xlu1 %v598_v6  ;;  %v149_v35 = vrot.slane %v64_v19, %v651_v24  ;;  %v424_v38 = vrot.slane %v554_v22, %v651_v24  ;;  %v83_v39 = vrot.slane %v73_v25, %v636_v17  ;;  %vm48_vm4 = vcmp.lt.s32.totalorder %v667_v51, 17 }
   0xc   :  { %193 = vperm.xlu0 %584, %v11_v1   ;;  %14 = vperm.xlu1 %583, %v11_v1   ;;  %v87_v40 = vrot.slane %v77_v26, %v636_v17  ;;  %v127_v41 = vrot.slane %v64_v19, %v126_v27  ;;  %v384_v42 = vrot.slane %v554_v22, %v100_v21  ;;  %vm50_vm5 = vcmp.lt.s32.totalorder %v667_v51, 16 }
   0xd   :  { %v370_v43 = vrot.slane %v360_v28, %v636_v17  ;;  %v107_v44 = vrot.slane %v97_v29, %v96_v20  ;;  %v111_v45 = vrot.slane %v101_v30, %v96_v20  ;;  %v390_v46 = vrot.slane %v380_v31, %v96_v20 }
   0xe   :  { %v133_v47 = vrot.slane %v123_v32, %v648_v23  ;;  %v412_v48 = vrot.slane %v402_v33, %v648_v23  ;;  %v153_v49 = vrot.slane %v64_v19, %v152_v34  ;;  %v159_v50 = vrot.slane %v149_v35, %v651_v24 }
   0xf   :  { %v364_v52 = vrot.slane %v554_v22, %v76_v18  ;;  %v434_v53 = vrot.slane %v424_v38, %v651_v24  ;;  %v137_v56 = vrot.slane %v127_v41, %v648_v23  ;;  %v394_v58 = vrot.slane %v384_v42, %v96_v20 }
  0x10   :  { %585 = vset.pattern.permute.xlu0 %v599_v7  ;;  %590 = vset.pattern.permute.xlu1 %v600_v8  ;;  %v163_v2 = vrot.slane %v153_v49, %v651_v24  ;;  %v406_v8 = vrot.slane %v554_v22, %v126_v27  ;;  %v428_v15 = vrot.slane %v554_v22, %v152_v34  ;;  %vm52_vm6 = vcmp.lt.s32.totalorder %v667_v51, 15 }
  0x11   :  { %213 = vperm.xlu0 %585, %v11_v1   ;;  %303 = vperm.xlu1 %590, %v11_v1   ;;  %vm54_vm7 = vcmp.lt.s32.totalorder %v667_v51, 1  ;;  %vm272_vm8 = vcmp.lt.s32.totalorder %v667_v51, 127  ;;  %vm314_vm10 = vcmp.lt.s32.totalorder %v667_v51, 112  ;;  %vm293_vm13 = vcmp.lt.s32.totalorder %v667_v51, 113 }
  0x12   :  { %v416_v25 = vrot.slane %v406_v8, %v648_v23  ;;  %v438_v22 = vrot.slane %v428_v15, %v651_v24  ;;  %v689_v23 = vadd.s32 128, %v667_v51  ;;  %vm335_vm14 = vcmp.lt.s32.totalorder %v667_v51, 111 }
  0x14   :  { %v31_v24 = vand.u32 15, %v689_v23  ;;  %vm61_vm9 = vcmp.ge.s32.totalorder %v689_v23, 240  ;;  %vm57_vm11 = vcmp.ge.s32.totalorder %v689_v23, 255  ;;  %vm59_vm12 = vcmp.ge.s32.totalorder %v689_v23, 241 }
  0x15   :  { %586 = vset.pattern.permute.xlu0 %v601_v9  ;;  %591 = vset.pattern.permute.xlu1 %v602_v10  ;;  %v24_v9 = vand.u32 15, %v667_v51  ;;  %v374_v10 = vrot.slane %v364_v52, %v636_v17  ;;  %vm63_vm15 = vcmp.ge.s32.totalorder %v689_v23, 239 }
  0x16   :  { %233 = vperm.xlu0 %586, %v11_v1   ;;  %324 = vperm.xlu1 %591, %v11_v1   ;;  %vm45_vm1 = vcmp.lt.s32.totalorder %v31_v24, 1  ;;  %vm47_vm2 = vcmp.ge.s32.totalorder %v31_v24, 15 }
  0x17   :  { %vm46_vm0 = vcmp.ge.s32.totalorder %v24_v9, 15  ;;  %vm44_vm3 = vcmp.lt.s32.totalorder %v24_v9, 1 }
  0x1a   :  { %587 = vset.pattern.permute.xlu0 %v603_v11 }
  0x1b   :  { %253 = vperm.xlu0 %587, %v11_v1  }
  0x1f   :  { %588 = vset.pattern.permute.xlu0 %v604_v12 }
  0x20   :  { %261 = vperm.xlu0 %588, %v11_v1  }
  0x24   :  { %589 = vset.pattern.permute.xlu0 %v605_v13 }
  0x25   :  { %282 = vperm.xlu0 %589, %v11_v1  }
  0x29   :  { %592 = vset.pattern.permute.xlu0 %v606_v14 }
  0x2a   :  { %345 = vperm.xlu0 %592, %v11_v1  }
  0x7d   :  { %v67_v36 = vpop.permute.xlu0 %66  ;;  %v118_v37 = vpop.permute.xlu1 %117 }
  0x7e   :  { %v88_v54 = vmul.f32 %v83_v39, %v67_v36  ;;  %v89_v55 = vmul.f32 %v87_v40, %v67_v36  ;;  %v375_v60 = vmul.f32 %v370_v43, %v67_v36  ;;  %v138_v0 = vmul.f32 %v133_v47, %v118_v37 }
  0x7f   :  { %v417_v1 = vmul.f32 %v412_v48, %v118_v37  ;;  %v139_v11 = vmul.f32 %v137_v56, %v118_v37  ;;  %v376_v21 = vmul.f32 %v374_v10, %v67_v36  ;;  %v418_v28 = vmul.f32 %v416_v25, %v118_v37 }
  0x82   :  { %v92_v57 = vpop.permute.xlu0 %91  ;;  %v144_v59 = vpop.permute.xlu1 %143 }
  0x83   :  { %v112_v61 = vmul.f32 %v107_v44, %v92_v57  ;;  %v113_v62 = vmul.f32 %v111_v45, %v92_v57  ;;  %v395_v63 = vmul.f32 %v390_v46, %v92_v57  ;;  %v164_v3 = vmul.f32 %v159_v50, %v144_v59 }
  0x84   :  { %v439_v7 = vmul.f32 %v434_v53, %v144_v59  ;;  %v396_v14 = vmul.f32 %v394_v58, %v92_v57  ;;  %v165_v18 = vmul.f32 %v163_v2, %v144_v59  ;;  %v440_v30 = vmul.f32 %v438_v22, %v144_v59 }
  0x85   :  { %v114_v4 = vadd.f32 %v112_v61, %v88_v54  ;;  %v115_v5 = vadd.f32 %v113_v62, %v89_v55  ;;  %v397_v6 = vadd.f32 %v395_v63, %v375_v60 }
  0x86   :  { %v398_v17 = vadd.f32 %v396_v14, %v376_v21 }
  0x87   :  { %v140_v12 = vadd.f32 %v138_v0, %v114_v4  ;;  %v419_v13 = vadd.f32 %v417_v1, %v397_v6  ;;  %v141_v16 = vadd.f32 %v139_v11, %v115_v5  ;;  %v716_v39 = vpop.permute.xlu1 %14  ;;  %v720_v41 = vpop.permute.xlu0 %193 }
  0x88   :  { %v420_v29 = vadd.f32 %v418_v28, %v398_v17 }
  0x89   :  { %v674_v19 = vadd.f32 %v164_v3, %v140_v12  ;;  %v676_v20 = vadd.f32 %v439_v7, %v419_v13  ;;  %v682_v26 = vadd.f32 %v165_v18, %v141_v16 }
  0x8a   :  { %v695_v32 = vadd.f32 %v440_v30, %v420_v29 }
  0x8b   :  { %523 = vrot.lane.b32.xlu0 %v676_v20, %s607_s0  ;;  %200 = vrot.lane.b32.xlu1 %v674_v19, %s608_s14  ;;  %v172_v27 = vsel %vm46_vm0, 0.0, %v674_v19  ;;  %v443_v31 = vsel %vm46_vm0, 0.0, %v676_v20  ;;  %v179_v33 = vsel %vm45_vm1, 0.0, %v682_v26  ;;  %v173_v35 = vsel %vm47_vm2, 0.0, %v682_v26 }
  0x8c   :  { %v446_v34 = vsel %vm45_vm1, 0.0, %v695_v32  ;;  %v178_v36 = vsel %vm44_vm3, 0.0, %v674_v19  ;;  %v445_v37 = vsel %vm44_vm3, 0.0, %v676_v20  ;;  %v444_v38 = vsel %vm47_vm2, 0.0, %v695_v32  ;;  %v718_v40 = vpop.permute.xlu1 %303  ;;  %v724_v43 = vpop.permute.xlu0 %213 }
  0x8f   :  { %202 = vrot.lane.b32.xlu1 %v682_v26, %s608_s14  ;;  %180 = vrot.lane.b32.xlu0 %v172_v27, %s609_s15 }
  0x91   :  { %v722_v42 = vpop.permute.xlu1 %324  ;;  %v726_v45 = vpop.permute.xlu0 %233 }
  0x93   :  { %459 = vrot.lane.b32.xlu1 %v676_v20, %s608_s14  ;;  %447 = vrot.lane.b32.xlu0 %v443_v31, %s609_s15 }
  0x96   :  { %v728_v47 = vpop.permute.xlu0 %253 }
  0x97   :  { %461 = vrot.lane.b32.xlu1 %v695_v32, %s608_s14  ;;  %483 = vrot.lane.b32.xlu0 %v443_v31, %s610_s16 }
  0x9b   :  { %310 = vrot.lane.b32.xlu1 %v674_v19, %s607_s0  ;;  %270 = vrot.lane.b32.xlu0 %v179_v33, %s611_s17  ;;  %v734_v50 = vpop.permute.xlu0 %261 }
  0x9f   :  { %312 = vrot.lane.b32.xlu1 %v682_v26, %s607_s0  ;;  %501 = vrot.lane.b32.xlu0 %v446_v34, %s611_s17 }
  0xa0   :  { %v738_v53 = vpop.permute.xlu0 %282 }
  0xa3   :  { %525 = vrot.lane.b32.xlu1 %v695_v32, %s607_s0  ;;  %289 = vrot.lane.b32.xlu0 %v172_v27, %s612_s18 }
  0xa5   :  { %v742_v55 = vpop.permute.xlu0 %345 }
  0xa7   :  { %182 = vrot.lane.b32.xlu1 %v173_v35, %s609_s15  ;;  %511 = vrot.lane.b32.xlu0 %v443_v31, %s612_s18 }
  0xab   :  { %220 = vrot.lane.b32.xlu1 %v178_v36, %s613_s19  ;;  %331 = vrot.lane.b32.xlu0 %v178_v36, %s614_s20 }
  0xaf   :  { %222 = vrot.lane.b32.xlu1 %v179_v33, %s613_s19  ;;  %535 = vrot.lane.b32.xlu0 %v445_v37, %s614_s20 }
  0xb3   :  { %449 = vrot.lane.b32.xlu1 %v444_v38, %s609_s15 }
  0xb7   :  { %471 = vrot.lane.b32.xlu1 %v445_v37, %s613_s19 }
  0xbb   :  { %473 = vrot.lane.b32.xlu1 %v446_v34, %s613_s19 }
  0xbf   :  { %240 = vrot.lane.b32.xlu1 %v172_v27, %s610_s16 }
  0xc3   :  { %242 = vrot.lane.b32.xlu1 %v173_v35, %s610_s16 }
  0xc7   :  { %485 = vrot.lane.b32.xlu1 %v444_v38, %s610_s16 }
  0xcb   :  { %268 = vrot.lane.b32.xlu1 %v178_v36, %s611_s17 }
  0xcf   :  { %499 = vrot.lane.b32.xlu1 %v445_v37, %s611_s17 }
  0xd3   :  { %291 = vrot.lane.b32.xlu1 %v173_v35, %s612_s18 }
  0xd7   :  { %513 = vrot.lane.b32.xlu1 %v444_v38, %s612_s18  ;;  %v265_v38 = vmul.f32 %v734_v50, %v682_v26 }
  0xdb   :  { %333 = vrot.lane.b32.xlu1 %v179_v33, %s614_s20 }
  0xdf   :  { %537 = vrot.lane.b32.xlu1 %v446_v34, %s614_s20 }
  0xfd   :  { %v201_v44 = vpop.permute.xlu1 %200  ;;  %v746_v58 = vpop.permute.xlu0 %523 }
 0x101   :  { %v203_v46 = vpop.permute.xlu1 %202  ;;  %v181_v60 = vpop.permute.xlu0 %180 }
 0x102   :  { %v205_v7 = vsel %vm50_vm5, %v203_v46, %v201_v44  ;;  %v204_v10 = vsel %vm50_vm5, %v201_v44, %v203_v46 }
 0x103   :  { %v210_v12 = vsel %vm50_vm5, 0.0, %v205_v7  ;;  %v217_v18 = vmul.f32 %v724_v43, %v204_v10 }
 0x104   :  { %v216_v22 = vmul.f32 %v724_v43, %v210_v12 }
 0x105   :  { %v730_v48 = vpop.permute.xlu1 %459  ;;  %v448_v63 = vpop.permute.xlu0 %447 }
 0x109   :  { %v732_v49 = vpop.permute.xlu1 %461  ;;  %v757_v4 = vpop.permute.xlu0 %483 }
 0x10d   :  { %v736_v52 = vpop.permute.xlu1 %310  ;;  %v271_v21 = vpop.permute.xlu0 %270 }
 0x111   :  { %v740_v54 = vpop.permute.xlu1 %312 }
 0x115   :  { %v744_v56 = vpop.permute.xlu1 %525 }
 0x119   :  { %v183_v57 = vpop.permute.xlu1 %182 }
 0x11a   :  { %v185_v0 = vsel %vm48_vm4, %v183_v57, %v181_v60  ;;  %v184_v2 = vsel %vm48_vm4, %v181_v60, %v183_v57  ;;  %v464_v57 = vsel %vm50_vm5, %v732_v49, %v730_v48 }
 0x11b   :  { %v190_v3 = vsel %vm48_vm4, 0.0, %v185_v0  ;;  %v197_v5 = vmul.f32 %v720_v41, %v184_v2  ;;  %v264_v0 = vmul.f32 %v734_v50, %v674_v19  ;;  %v465_v7 = vsel %vm50_vm5, 0.0, %v464_v57 }
 0x11c   :  { %v196_v8 = vmul.f32 %v720_v41, %v190_v3  ;;  %v463_v19 = vsel %vm50_vm5, %v730_v48, %v732_v49  ;;  %v495_v48 = vmul.f32 %v676_v20, %v734_v50  ;;  %v467_v49 = vmul.f32 %v465_v7, %v724_v43 }
 0x11d   :  { %v221_v59 = vpop.permute.xlu1 %220  ;;  %v199_v13 = vadd.f32 %v197_v5, %v716_v39  ;;  %v315_v20 = vsel %vm314_vm10, %v736_v52, %v740_v54 }
 0x11e   :  { %v198_v16 = vadd.f32 %v196_v8, %v716_v39 }
 0x11f   :  { %v219_v28 = vadd.f32 %v217_v18, %v199_v13 }
 0x120   :  { %v218_v30 = vadd.f32 %v216_v22, %v198_v16 }
 0x121   :  { %v223_v61 = vpop.permute.xlu1 %222 }
 0x122   :  { %v225_v9 = vsel %vm52_vm6, %v223_v61, %v221_v59  ;;  %v224_v11 = vsel %vm52_vm6, %v221_v59, %v223_v61  ;;  %v502_v59 = vpop.permute.xlu0 %501 }
 0x123   :  { %v230_v14 = vsel %vm52_vm6, 0.0, %v225_v9  ;;  %v237_v25 = vmul.f32 %v726_v45, %v224_v11 }
 0x124   :  { %v236_v27 = vmul.f32 %v726_v45, %v230_v14 }
 0x125   :  { %v450_v62 = vpop.permute.xlu1 %449  ;;  %v239_v34 = vadd.f32 %v237_v25, %v219_v28 }
 0x126   :  { %v452_v17 = vsel %vm48_vm4, %v450_v62, %v448_v63  ;;  %v451_v35 = vsel %vm48_vm4, %v448_v63, %v450_v62  ;;  %v238_v44 = vadd.f32 %v236_v27, %v218_v30 }
 0x127   :  { %v453_v31 = vsel %vm48_vm4, 0.0, %v452_v17  ;;  %v456_v26 = vmul.f32 %v451_v35, %v720_v41  ;;  %v528_v35 = vsel %vm314_vm10, %v744_v56, %v746_v58 }
 0x128   :  { %v455_v60 = vmul.f32 %v453_v31, %v720_v41 }
 0x129   :  { %v472_v1 = vpop.permute.xlu1 %471  ;;  %v458_v12 = vadd.f32 %v456_v26, %v716_v39  ;;  %v530_v26 = vsel %vm61_vm9, 0.0, %v528_v35 }
 0x12a   :  { %v457_v41 = vadd.f32 %v455_v60, %v716_v39 }
 0x12c   :  { %v469_v17 = vadd.f32 %v467_v49, %v457_v41 }
 0x12d   :  { %v474_v6 = vpop.permute.xlu1 %473 }
 0x12e   :  { %v476_v61 = vsel %vm52_vm6, %v474_v6, %v472_v1  ;;  %v475_v10 = vsel %vm52_vm6, %v472_v1, %v474_v6  ;;  %v496_v1 = vmul.f32 %v695_v32, %v734_v50  ;;  %v468_v6 = vmul.f32 %v463_v19, %v724_v43 }
 0x12f   :  { %v477_v8 = vsel %vm52_vm6, 0.0, %v476_v61  ;;  %v480_v18 = vmul.f32 %v475_v10, %v726_v45  ;;  %v316_v32 = vsel %vm314_vm10, %v740_v54, %v736_v52  ;;  %v327_v52 = vmul.f32 %v722_v42, %v315_v20 }
 0x130   :  { %v479_v16 = vmul.f32 %v477_v8, %v726_v45  ;;  %v470_v43 = vadd.f32 %v468_v6, %v458_v12 }
 0x131   :  { %v241_v15 = vpop.permute.xlu1 %240 }
 0x135   :  { %v243_v29 = vpop.permute.xlu1 %242 }
 0x136   :  { %v244_v24 = vsel %vm54_vm7, %v241_v15, %v243_v29  ;;  %v245_v33 = vsel %vm54_vm7, %v243_v29, %v241_v15  ;;  %v290_v15 = vpop.permute.xlu0 %289  ;;  %v482_v29 = vadd.f32 %v480_v18, %v470_v43 }
 0x137   :  { %v250_v36 = vsel %vm54_vm7, 0.0, %v245_v33  ;;  %v257_v37 = vmul.f32 %v728_v47, %v244_v24 }
 0x138   :  { %v256_v46 = vmul.f32 %v728_v47, %v250_v36 }
 0x139   :  { %v259_v62 = vadd.f32 %v257_v37, %v239_v34  ;;  %v486_v63 = vpop.permute.xlu1 %485 }
 0x13a   :  { %v258_v2 = vadd.f32 %v256_v46, %v238_v44  ;;  %v488_v5 = vsel %vm54_vm7, %v486_v63, %v757_v4  ;;  %v487_v39 = vsel %vm54_vm7, %v757_v4, %v486_v63  ;;  %v512_v54 = vpop.permute.xlu0 %511 }
 0x13b   :  { %v267_v3 = vadd.f32 %v265_v38, %v259_v62  ;;  %v489_v13 = vsel %vm54_vm7, 0.0, %v488_v5  ;;  %v492_v45 = vmul.f32 %v487_v39, %v728_v47 }
 0x13c   :  { %v266_v9 = vadd.f32 %v264_v0, %v258_v2  ;;  %v491_v22 = vmul.f32 %v489_v13, %v728_v47  ;;  %v322_v47 = vsel %vm61_vm9, 0.0, %v316_v32  ;;  %v527_v0 = vsel %vm314_vm10, %v746_v58, %v744_v56 }
 0x13d   :  { %v269_v11 = vpop.permute.xlu1 %268  ;;  %v494_v36 = vadd.f32 %v492_v45, %v482_v29  ;;  %v328_v60 = vmul.f32 %v722_v42, %v322_v47 }
 0x13e   :  { %v274_v14 = vsel %vm272_vm8, %v271_v21, %v269_v11  ;;  %v273_v25 = vsel %vm272_vm8, %v269_v11, %v271_v21  ;;  %v481_v21 = vadd.f32 %v479_v16, %v469_v17  ;;  %v332_v19 = vpop.permute.xlu0 %331 }
 0x13f   :  { %v280_v4 = vsel %vm57_vm11, 0.0, %v274_v14  ;;  %v285_v28 = vmul.f32 %v738_v53, %v273_v25  ;;  %v498_v8 = vadd.f32 %v496_v1, %v494_v36  ;;  %v531_v14 = vmul.f32 %v527_v0, %v722_v42 }
 0x140   :  { %v286_v30 = vmul.f32 %v738_v53, %v280_v4  ;;  %v493_v24 = vadd.f32 %v491_v22, %v481_v21 }
 0x141   :  { %v500_v27 = vpop.permute.xlu1 %499  ;;  %v287_v44 = vadd.f32 %v285_v28, %v266_v9 }
 0x142   :  { %v504_v50 = vsel %vm272_vm8, %v502_v59, %v500_v27  ;;  %v503_v31 = vsel %vm272_vm8, %v500_v27, %v502_v59  ;;  %v288_v61 = vadd.f32 %v286_v30, %v267_v3  ;;  %v497_v2 = vadd.f32 %v495_v48, %v493_v24  ;;  %v536_v17 = vpop.permute.xlu0 %535 }
 0x143   :  { %v506_v33 = vsel %vm57_vm11, 0.0, %v504_v50  ;;  %v507_v46 = vmul.f32 %v503_v31, %v738_v53 }
 0x144   :  { %v508_v62 = vmul.f32 %v506_v33, %v738_v53 }
 0x145   :  { %v292_v34 = vpop.permute.xlu1 %291  ;;  %v509_v41 = vadd.f32 %v507_v46, %v497_v2 }
 0x146   :  { %v294_v37 = vsel %vm293_vm13, %v290_v15, %v292_v34  ;;  %v295_v38 = vsel %vm293_vm13, %v292_v34, %v290_v15  ;;  %v510_v11 = vadd.f32 %v508_v62, %v498_v8  ;;  %v532_v15 = vmul.f32 %v530_v26, %v722_v42 }
 0x147   :  { %v301_v57 = vsel %vm59_vm12, 0.0, %v295_v38  ;;  %v306_v59 = vmul.f32 %v718_v40, %v294_v37 }
 0x148   :  { %v307_v63 = vmul.f32 %v718_v40, %v301_v57 }
 0x149   :  { %v308_v5 = vadd.f32 %v306_v59, %v287_v44  ;;  %v514_v7 = vpop.permute.xlu1 %513 }
 0x14a   :  { %v309_v9 = vadd.f32 %v307_v63, %v288_v61  ;;  %v515_v3 = vsel %vm293_vm13, %v512_v54, %v514_v7  ;;  %v516_v53 = vsel %vm293_vm13, %v514_v7, %v512_v54 }
 0x14b   :  { %v518_v10 = vsel %vm59_vm12, 0.0, %v516_v53  ;;  %v519_v56 = vmul.f32 %v515_v3, %v718_v40  ;;  %v329_v58 = vadd.f32 %v327_v52, %v308_v5 }
 0x14c   :  { %v520_v12 = vmul.f32 %v518_v10, %v718_v40  ;;  %v330_v13 = vadd.f32 %v328_v60, %v309_v9 }
 0x14d   :  { %v521_v48 = vadd.f32 %v519_v56, %v509_v41  ;;  %v334_v49 = vpop.permute.xlu1 %333 }
 0x14e   :  { %v522_v16 = vadd.f32 %v520_v12, %v510_v11  ;;  %v336_v39 = vsel %vm335_vm14, %v332_v19, %v334_v49  ;;  %v337_v1 = vsel %vm335_vm14, %v334_v49, %v332_v19 }
 0x14f   :  { %v343_v6 = vsel %vm63_vm15, 0.0, %v337_v1  ;;  %v348_v40 = vmul.f32 %v742_v55, %v336_v39  ;;  %v533_v18 = vadd.f32 %v531_v14, %v521_v48 }
 0x150   :  { %v349_v25 = vmul.f32 %v742_v55, %v343_v6  ;;  %v534_v20 = vadd.f32 %v532_v15, %v522_v16 }
 0x151   :  { %v350_v22 = vadd.f32 %v348_v40, %v329_v58  ;;  %v538_v4 = vpop.permute.xlu1 %537 }
 0x152   :  { %v351_v42 = vadd.f32 %v349_v25, %v330_v13  ;;  %v539_v27 = vsel %vm335_vm14, %v536_v17, %v538_v4  ;;  %v540_v32 = vsel %vm335_vm14, %v538_v4, %v536_v17 }
 0x153   :  { %352 = vst [vmem:[%s930_s2] sm:$0xff] %v350_v22  ;;  %v542_v43 = vsel %vm63_vm15, 0.0, %v540_v32  ;;  %v543_v45 = vmul.f32 %v539_v27, %v742_v55 }
 0x154   :  { %353 = vst [vmem:[%s930_s2 + $0x8] sm:$0xff] %v351_v42  ;;  %v544_v50 = vmul.f32 %v542_v43, %v742_v55 }
 0x155   :  { %v545_v21 = vadd.f32 %v543_v45, %v533_v18 }
 0x156   :  { %v546_v28 = vadd.f32 %v544_v50, %v534_v20 }
 0x157   :  { %555 = vst [vmem:[%s930_s2 + $0x10] sm:$0xff] %v545_v21 }
 0x158   :  { %556 = vst [vmem:[%s930_s2 + $0x18] sm:$0xff] %v546_v28 }

</bundles_post_ra>
